<compile_context>
chip_gen: v5e
topology: v5e:2x2
jax: 0.10.0
libtpu: 0.0.40
codegen_flags: <defaults>
</compile_context>

<pallas_src>
import jax
import jax.numpy as jnp
from jax.experimental import pallas as pl
from jax.experimental.pallas import tpu as pltpu

IN_FEATURES = 384
OUT_FEATURES = 1


def _round_up(n, m):
    return ((n + m - 1) // m) * m


def _regression_kernel(x_ref, w_ref, b_ref, o_ref):
    # x_ref: (tb, 384) VMEM tile of the batch (dtype = caller's dtype)
    # w_ref: (384, 1)  VMEM, resident across all grid steps
    # b_ref: (1, 1)    SMEM scalar bias
    # o_ref: (tb, 1)   VMEM output tile
    x = x_ref[...].astype(jnp.float32)          # per-tile upcast (no-op for f32 input)
    y = jnp.dot(x, w_ref[...], preferred_element_type=jnp.float32)  # MXU: (tb, 1)
    o_ref[...] = jnp.maximum(y + b_ref[0, 0], 0.0).astype(o_ref.dtype)


def regression_forward(x, w, b, *, tile_rows=4096):
    """x: (B, 384), w: (384, 1), b: (1,)  ->  (B,) f32 = ReLU(x @ w + b)."""
    B = x.shape[0]
    assert x.shape[1] == IN_FEATURES

    # Rows per grid step: sublane-aligned (128-aligned for large tiles).
    # No padding/copies of x in the wrapper -- Pallas clamps/masks the DMA of
    # the ragged last block and drops out-of-bounds output rows.
    tb = min(_round_up(tile_rows, 128), _round_up(B, 8))
    if B > 256:
        # Guarantee >= 2 grid steps so v7x megacore can shard across both TCs.
        tb = min(tb, _round_up(pl.cdiv(B, 2), 128))
    tb = max(tb, 8)
    grid = (pl.cdiv(B, tb),)

    w2 = w.reshape(IN_FEATURES, OUT_FEATURES).astype(jnp.float32)
    b_smem = b.reshape(1, 1).astype(jnp.float32)

    out = pl.pallas_call(
        _regression_kernel,
        out_shape=jax.ShapeDtypeStruct((B, OUT_FEATURES), jnp.float32),
        grid=grid,
        in_specs=[
            pl.BlockSpec((tb, IN_FEATURES), lambda i: (i, 0)),          # streamed x tiles
            pl.BlockSpec((IN_FEATURES, OUT_FEATURES), lambda i: (0, 0)),  # resident weights
            pl.BlockSpec(memory_space=pltpu.MemorySpace.SMEM),            # scalar bias
        ],
        out_specs=pl.BlockSpec((tb, OUT_FEATURES), lambda i: (i, 0)),
        compiler_params=pltpu.CompilerParams(
            dimension_semantics=("parallel",),     # v7x: shard batch tiles across 2 TCs
            vmem_limit_bytes=32 * 1024 * 1024,     # covers 2 x 6 MiB x-buffers comfortably
        ),
    )(x, w2, b_smem)

    # (B, 1) -> (B,): contiguous, free metadata reshape.
    return out.reshape(B)


def init_params(key):
    # Mimic PyTorch nn.Linear default init: U(-1/sqrt(fan_in), 1/sqrt(fan_in))
    kw, kb = jax.random.split(key)
    bound = 1.0 / jnp.sqrt(jnp.float32(IN_FEATURES))
    w = jax.random.uniform(
        kw, (IN_FEATURES, OUT_FEATURES), jnp.float32, -bound, bound
    )
    b = jax.random.uniform(kb, (OUT_FEATURES,), jnp.float32, -bound, bound)
    return w, b


if __name__ == "__main__":
    key = jax.random.PRNGKey(0)
    kx, kp = jax.random.split(key)
    w, b = init_params(kp)

    # Small primary case (single grid step, no padding of any kind).
    batch = 8
    x = jax.random.normal(kx, (batch, IN_FEATURES), jnp.float32)
    y = regression_forward(x, w, b)
    jax.block_until_ready(y)
    y_ref = jnp.maximum(x @ w + b, 0.0)[:, 0]
    assert y.shape == (batch,)
    assert jnp.allclose(y, y_ref, atol=1e-4, rtol=1e-4)

    # Multi-step grid + ragged last block (300 rows -> two 256-row steps,
    # last step only 44 rows valid) -- no wrapper-side pad copy.
    batch2 = 300
    x2 = jax.random.normal(kx, (batch2, IN_FEATURES), jnp.float32)
    y2 = regression_forward(x2, w, b, tile_rows=256)
    jax.block_until_ready(y2)
    y2_ref = jnp.maximum(x2 @ w + b, 0.0)[:, 0]
    assert y2.shape == (batch2,)
    assert jnp.allclose(y2, y2_ref, atol=1e-4, rtol=1e-4)

    print("KERNEL_OK")
</pallas_src>

<mosaic_0001>
module attributes {stable_mosaic.version = 11 : i64} {
  func.func @_regression_kernel(%arg0: i32, %arg1: memref<8x384xf32, #tpu.memory_space<vmem>>, %arg2: memref<384x1xf32, #tpu.memory_space<vmem>>, %arg3: memref<1x1xf32, #tpu.memory_space<smem>>, %arg4: memref<8x1xf32, #tpu.memory_space<vmem>>) attributes {dimension_semantics = [#tpu.dimension_semantics<parallel>], iteration_bounds = array<i64: 1>, scalar_prefetch = 0 : i64, scratch_operands = 0 : i64, tpu.core_type = #tpu.core_type<tc>, window_params = [{transform_indices = @transform_0, window_bounds = array<i64: 8, 384>}, {pipeline_mode = #tpu.pipeline_mode<synchronous>, transform_indices = @transform_1, window_bounds = array<i64: 384, 1>}, {transform_indices = @transform_2, window_bounds = array<i64: 1, 1>}, {transform_indices = @transform_3, window_bounds = array<i64: 8, 1>}]} {
    %c0 = arith.constant 0 : index
    %c0_0 = arith.constant 0 : index
    %0 = vector.load %arg1[%c0, %c0_0] : memref<8x384xf32, #tpu.memory_space<vmem>>, vector<8x384xf32>
    %c0_1 = arith.constant 0 : index
    %c0_2 = arith.constant 0 : index
    %1 = vector.load %arg2[%c0_1, %c0_2] : memref<384x1xf32, #tpu.memory_space<vmem>>, vector<384x1xf32>
    %cst = arith.constant dense<0.000000e+00> : vector<8x1xf32>
    %2 = tpu.matmul %0, %1, %cst {dimension_numbers = #tpu.dot_dimension_numbers<[1], [0], [0], [1], [0, 0, 1, 1], [], []>} : vector<8x384xf32>, vector<384x1xf32>, vector<8x1xf32> -> vector<8x1xf32>
    %c0_3 = arith.constant 0 : index
    %c0_4 = arith.constant 0 : index
    %3 = memref.load %arg3[%c0_3, %c0_4] : memref<1x1xf32, #tpu.memory_space<smem>>
    %4 = vector.broadcast %3 : f32 to vector<8x1xf32>
    %5 = arith.addf %2, %4 : vector<8x1xf32>
    %cst_5 = arith.constant 0.000000e+00 : f32
    %6 = vector.broadcast %cst_5 : f32 to vector<8x1xf32>
    %7 = arith.maximumf %5, %6 : vector<8x1xf32>
    %c0_6 = arith.constant 0 : index
    %c0_7 = arith.constant 0 : index
    %8 = vector.load %arg4[%c0_6, %c0_7] : memref<8x1xf32, #tpu.memory_space<vmem>>, vector<8x1xf32>
    tpu.vector_store %arg4[%c0_6, %c0_7], %7 {strides = array<i32>} : memref<8x1xf32, #tpu.memory_space<vmem>>, vector<8x1xf32>,
    return
  }
  func.func @transform_0(%arg0: i32) -> (i32, i32) {
    %c0_i32 = arith.constant 0 : i32
    %c0_i32_0 = arith.constant 0 : i32
    return %arg0, %c0_i32 : i32, i32
  }
  func.func @transform_1(%arg0: i32) -> (i32, i32) {
    %c0_i32 = arith.constant 0 : i32
    %c0_i32_0 = arith.constant 0 : i32
    %c0_i32_1 = arith.constant 0 : i32
    return %c0_i32, %c0_i32_0 : i32, i32
  }
  func.func @transform_2(%arg0: i32) -> (i32, i32) {
    %c0_i32 = arith.constant 0 : i32
    %c0_i32_0 = arith.constant 0 : i32
    %c0_i32_1 = arith.constant 0 : i32
    return %c0_i32, %c0_i32_0 : i32, i32
  }
  func.func @transform_3(%arg0: i32) -> (i32, i32) {
    %c0_i32 = arith.constant 0 : i32
    %c0_i32_0 = arith.constant 0 : i32
    return %arg0, %c0_i32 : i32, i32
  }
}

</mosaic_0001>

<bundles_post_ra>
// kernel: tpu_custom_call.1
= control target key start
LH: loop header
LB: loop body
LE: loop exit
PB: predicated region body
PF: predicated region fallthrough
CT: control target
= control target key end

     0   :  { %vm129_vm0 = vcmask 7168   ;;  %s314_s1 = inlined_call_operand.vmem [shape: f32[384,1], index: 1, kind: input, shape index: {}]   ;;  %s315_s0 = inlined_call_operand.vmem [shape: f32[8,384], index: 0, kind: input, shape index: {}]   ;;  %s316_s2 = inlined_call_operand.<no memory space> [shape: f32[1,1], index: 2, kind: input, shape index: {}]   ;;  %s317_s3 = inlined_call_operand.vmem [shape: f32[8,1], index: 3, kind: output, shape index: {}]  }
   0x1   :  { %v65_v0 = vld [vmem:[%s314_s1 + $0x178] sm:$0xff]  ;;  %v64_v2 = vld [vmem:[%s314_s1 + $0x170] sm:$0xff]  ;;  %v63_v5 = vld [vmem:[%s314_s1 + $0x168] sm:$0xff]  ;;  %v67_v51 = vstv %s316_s2 }
   0x2   :  { %v33_v1 = vld [vmem:[%s314_s1 + $0x78] sm:$0xff]  ;;  %108 = vmatpush.msra.mxu2 %v65_v0  ;;  %v32_v3 = vld [vmem:[%s314_s1 + $0x70] sm:$0xff]  ;;  %v31_v6 = vld [vmem:[%s314_s1 + $0x68] sm:$0xff] }
   0x3   :  { %68 = vmatpush.msra.mxu0 %v33_v1  ;;  %v49_v4 = vld [vmem:[%s314_s1 + $0xf8] sm:$0xff]  ;;  %v48_v7 = vld [vmem:[%s314_s1 + $0xf0] sm:$0xff]  ;;  %v47_v8 = vld [vmem:[%s314_s1 + $0xe8] sm:$0xff] }
   0x4   :  { %88 = vmatpush.msra.mxu1 %v49_v4  ;;  %109 = vmatpush.msra.mxu2 %v64_v2  ;;  %v62_v9 = vld [vmem:[%s314_s1 + $0x160] sm:$0xff]  ;;  %v61_v12 = vld [vmem:[%s314_s1 + $0x158] sm:$0xff]  ;;  %v60_v15 = vld [vmem:[%s314_s1 + $0x150] sm:$0xff] }
   0x5   :  { %69 = vmatpush.msra.mxu0 %v32_v3  ;;  %v30_v10 = vld [vmem:[%s314_s1 + $0x60] sm:$0xff]  ;;  %v29_v13 = vld [vmem:[%s314_s1 + $0x58] sm:$0xff]  ;;  %v28_v16 = vld [vmem:[%s314_s1 + $0x50] sm:$0xff] }
   0x6   :  { %89 = vmatpush.msra.mxu1 %v48_v7  ;;  %110 = vmatpush.msra.mxu2 %v63_v5  ;;  %v46_v11 = vld [vmem:[%s314_s1 + $0xe0] sm:$0xff]  ;;  %v45_v14 = vld [vmem:[%s314_s1 + $0xd8] sm:$0xff]  ;;  %v44_v17 = vld [vmem:[%s314_s1 + $0xd0] sm:$0xff] }
   0x7   :  { %70 = vmatpush.msra.mxu0 %v31_v6  ;;  %v59_v18 = vld [vmem:[%s314_s1 + $0x148] sm:$0xff]  ;;  %v58_v21 = vld [vmem:[%s314_s1 + $0x140] sm:$0xff]  ;;  %v57_v24 = vld [vmem:[%s314_s1 + $0x138] sm:$0xff] }
   0x8   :  { %90 = vmatpush.msra.mxu1 %v47_v8  ;;  %111 = vmatpush.msra.mxu2 %v62_v9  ;;  %v27_v19 = vld [vmem:[%s314_s1 + $0x48] sm:$0xff]  ;;  %v26_v22 = vld [vmem:[%s314_s1 + $0x40] sm:$0xff]  ;;  %v25_v25 = vld [vmem:[%s314_s1 + $0x38] sm:$0xff] }
   0x9   :  { %71 = vmatpush.msra.mxu0 %v30_v10  ;;  %v43_v20 = vld [vmem:[%s314_s1 + $0xc8] sm:$0xff]  ;;  %v42_v23 = vld [vmem:[%s314_s1 + $0xc0] sm:$0xff]  ;;  %v41_v26 = vld [vmem:[%s314_s1 + $0xb8] sm:$0xff] }
   0xa   :  { %91 = vmatpush.msra.mxu1 %v46_v11  ;;  %112 = vmatpush.msra.mxu2 %v61_v12  ;;  %v56_v27 = vld [vmem:[%s314_s1 + $0x130] sm:$0xff]  ;;  %v55_v30 = vld [vmem:[%s314_s1 + $0x128] sm:$0xff]  ;;  %v54_v33 = vld [vmem:[%s314_s1 + $0x120] sm:$0xff] }
   0xb   :  { %72 = vmatpush.msra.mxu0 %v29_v13  ;;  %v24_v28 = vld [vmem:[%s314_s1 + $0x30] sm:$0xff]  ;;  %v23_v31 = vld [vmem:[%s314_s1 + $0x28] sm:$0xff]  ;;  %v22_v34 = vld [vmem:[%s314_s1 + $0x20] sm:$0xff] }
   0xc   :  { %92 = vmatpush.msra.mxu1 %v45_v14  ;;  %113 = vmatpush.msra.mxu2 %v60_v15  ;;  %v40_v29 = vld [vmem:[%s314_s1 + $0xb0] sm:$0xff]  ;;  %v39_v32 = vld [vmem:[%s314_s1 + $0xa8] sm:$0xff]  ;;  %v38_v35 = vld [vmem:[%s314_s1 + $0xa0] sm:$0xff] }
   0xd   :  { %73 = vmatpush.msra.mxu0 %v28_v16  ;;  %v53_v36 = vld [vmem:[%s314_s1 + $0x118] sm:$0xff]  ;;  %v52_v39 = vld [vmem:[%s314_s1 + $0x110] sm:$0xff]  ;;  %v51_v42 = vld [vmem:[%s314_s1 + $0x108] sm:$0xff] }
   0xe   :  { %93 = vmatpush.msra.mxu1 %v44_v17  ;;  %114 = vmatpush.msra.mxu2 %v59_v18  ;;  %v21_v37 = vld [vmem:[%s314_s1 + $0x18] sm:$0xff]  ;;  %v20_v40 = vld [vmem:[%s314_s1 + $0x10] sm:$0xff]  ;;  %v19_v43 = vld [vmem:[%s314_s1 + $0x8] sm:$0xff] }
   0xf   :  { %74 = vmatpush.msra.mxu0 %v27_v19  ;;  %v37_v38 = vld [vmem:[%s314_s1 + $0x98] sm:$0xff]  ;;  %v36_v41 = vld [vmem:[%s314_s1 + $0x90] sm:$0xff]  ;;  %v35_v44 = vld [vmem:[%s314_s1 + $0x88] sm:$0xff] }
  0x10   :  { %94 = vmatpush.msra.mxu1 %v43_v20  ;;  %115 = vmatpush.msra.mxu2 %v58_v21  ;;  %v50_v45 = vld [vmem:[%s314_s1 + $0x100] sm:$0xff]  ;;  %v17_v47 = vld [vmem:[%s315_s0 + $0x10] sm:$0xff]  ;;  %v16_v50 = vld [vmem:[%s315_s0 + $0x8] sm:$0xff] }
  0x11   :  { %75 = vmatpush.msra.mxu0 %v26_v22  ;;  %v18_v46 = vld [vmem:[%s314_s1] sm:$0xff] }
  0x12   :  { %95 = vmatpush.msra.mxu1 %v42_v23  ;;  %116 = vmatpush.msra.mxu2 %v57_v24  ;;  %v15_v48 = vld [vmem:[%s315_s0] sm:$0xff] }
  0x13   :  { %76 = vmatpush.msra.mxu0 %v25_v25  ;;  %v34_v49 = vld [vmem:[%s314_s1 + $0x80] sm:$0xff] }
  0x14   :  { %96 = vmatpush.msra.mxu1 %v41_v26  ;;  %117 = vmatpush.msra.mxu2 %v56_v27 }
  0x15   :  { %77 = vmatpush.msra.mxu0 %v24_v28 }
  0x16   :  { %97 = vmatpush.msra.mxu1 %v40_v29  ;;  %118 = vmatpush.msra.mxu2 %v55_v30 }
  0x17   :  { %78 = vmatpush.msra.mxu0 %v23_v31 }
  0x18   :  { %98 = vmatpush.msra.mxu1 %v39_v32  ;;  %119 = vmatpush.msra.mxu2 %v54_v33 }
  0x19   :  { %79 = vmatpush.msra.mxu0 %v22_v34 }
  0x1a   :  { %99 = vmatpush.msra.mxu1 %v38_v35  ;;  %120 = vmatpush.msra.mxu2 %v53_v36 }
  0x1b   :  { %80 = vmatpush.msra.mxu0 %v21_v37 }
  0x1c   :  { %100 = vmatpush.msra.mxu1 %v37_v38  ;;  %121 = vmatpush.msra.mxu2 %v52_v39 }
  0x1d   :  { %81 = vmatpush.msra.mxu0 %v20_v40 }
  0x1e   :  { %101 = vmatpush.msra.mxu1 %v36_v41  ;;  %122 = vmatpush.msra.mxu2 %v51_v42 }
  0x1f   :  { %82 = vmatpush.msra.mxu0 %v19_v43 }
  0x20   :  { %102 = vmatpush.msra.mxu1 %v35_v44  ;;  %123 = vmatpush.msra.mxu2 %v50_v45 }
  0x21   :  { %83 = vmatpush.msra.mxu0 %v18_v46  ;;  %124 = vmatmul.f32.vlgmr.msra.gmra.mxu2 %v17_v47 }
  0x22   :  { %84 = vmatmul.f32.vlgmr.msra.gmra.mxu0 %v15_v48  ;;  %103 = vmatpush.msra.mxu1 %v34_v49 }
  0x23   :  { %104 = vmatmul.f32.vlgmr.msra.gmra.mxu1 %v16_v50 }
  0x9f   :  { %v85_v52 = vpop.f32.mrf.mxu0 }
  0xa0   :  { %v86_v53 = vadd.f32 %v85_v52, %v67_v51  ;;  %v105_v54 = vpop.f32.mrf.mxu1 }
  0xa2   :  { %v106_v55 = vadd.f32 %v105_v54, %v86_v53 }
  0xa4   :  { %v125_v56 = vpop.f32.mrf.mxu2 }
  0xa5   :  { %v126_v57 = vadd.f32 %v125_v56, %v106_v55 }
  0xa7   :  { %v128_v58 = vmax.f32 %v126_v57, 0.0 }
  0xa9   :  { %130 = vst.msk [vmem:[%s317_s3] sm:$0xff] %vm129_vm0, %v128_v58 }

</bundles_post_ra>
